<compile_context>
chip_gen: v6e
topology: v6e:2x2x1
jax: 0.10.0
libtpu: 0.0.40
codegen_flags: <defaults>
</compile_context>

<pallas_src>
import functools

import numpy as np

import jax
import jax.numpy as jnp
from jax.experimental import pallas as pl
from jax.experimental.pallas import tpu as pltpu


def _round_up(x, m):
    return ((x + m - 1) // m) * m


# ----------------------------- Pallas kernel -------------------------------


def _pba_ff_kernel(hidden_ref, pos_ref, beh_ref, lnw_ref, col2e_ref,
                   wi_h_ref, emb_proj_ref, wo_ref, out_ref, *,
                   eps, matmul_dtype):
    """One grid step = one token tile; all experts fused into wide matmuls.

    hidden_ref:   (TN, D)          original hidden states (residual + norm in)
    pos_ref:      (TN, 1)  i32     expert routing id per token
    beh_ref:      (TN, 1)  i32     behavior id per token
    lnw_ref:      (1, D)   f32     RMSNorm scale
    col2e_ref:    (1, EFp) i32     column -> expert id map (precomputed)
    wi_h_ref:     (D, EFp) mdt     stacked expert Wi rows for the normed hidden
    emb_proj_ref: (NBp, EFp) mdt   behavior_embedding @ Wi_b (precomputed)
    wo_ref:       (EFp, D) mdt     stacked expert Wo (zero rows in the padding)
    out_ref:      (TN, D)          hidden + moe(next_states)
    """
    tn = hidden_ref.shape[0]
    nbp = emb_proj_ref.shape[0]

    # --- T5/Switch RMSNorm (no mean subtraction, no bias), f32, once --------
    h = hidden_ref[...].astype(jnp.float32)
    var = jnp.mean(h * h, axis=-1, keepdims=True)
    normed = h * jax.lax.rsqrt(var + eps) * lnw_ref[...]

    # --- behavior embedding contribution via one-hot @ precomputed table ----
    beh_onehot = (jax.lax.broadcasted_iota(jnp.int32, (tn, nbp), 1)
                  == beh_ref[...]).astype(matmul_dtype)

    # --- first matmul over ALL experts at once -------------------------------
    # concat(normed, emb) @ Wi_all == normed @ Wi_h + emb @ Wi_b
    #                              == normed @ Wi_h + onehot(beh) @ emb_proj
    acc = (jnp.dot(normed.astype(matmul_dtype), wi_h_ref[...],
                   preferred_element_type=jnp.float32)
           + jnp.dot(beh_onehot, emb_proj_ref[...],
                     preferred_element_type=jnp.float32))          # (TN, EFp)

    # --- fused relu + expert routing mask + cast (single pass over acc) -----
    # Column c belongs to expert col2e[c]; zeroed columns contribute nothing
    # to the stacked Wo matmul, reproducing the per-expert overwrite exactly
    # (each token matches at most one expert; out-of-range ids -> residual).
    keep = (col2e_ref[...] == pos_ref[...]) & (acc > 0.0)
    mid = jnp.where(keep, acc, 0.0).astype(matmul_dtype)

    # --- second matmul over the stacked expert outputs ----------------------
    y = jnp.dot(mid, wo_ref[...], preferred_element_type=jnp.float32)  # (TN, D)

    # residual add; dropout is identity in eval mode.  One store per tile.
    out_ref[...] = (h + y).astype(out_ref.dtype)


# ------------------------------ JAX wrapper ---------------------------------


def pba_layer_ff(hidden, position_index, behavior_index, params, *,
                 eps=1e-6, matmul_dtype=jnp.bfloat16, token_tile=2048):
    """hidden: (B, S, D); position_index, behavior_index: (B, S) int."""
    B, S, D = hidden.shape
    N = B * S

    wi = params["wi"]                            # (E, D + E_b, F)
    wo = params["wo"]                            # (E, F, D)
    num_experts, d_in, d_ff = wi.shape
    ef = num_experts * d_ff
    ef_pad = _round_up(ef, 128)                  # lane-dense intermediate

    # Stack experts along the matmul width once, wrapper-side, and zero-pad
    # the expert axis to a multiple of 128 columns/rows.
    wi_all = jnp.transpose(wi, (1, 0, 2)).reshape(d_in, ef)
    wi_h = jnp.pad(wi_all[:D], ((0, 0), (0, ef_pad - ef)))           # (D, EFp)
    wi_b = wi_all[D:]                                                # (E_b, EF)
    wo_all = jnp.pad(wo.reshape(ef, D), ((0, ef_pad - ef), (0, 0)))  # (EFp, D)

    # Fold the behavior-embedding gather + dot into a tiny projection table.
    emb_tbl = params["behavior_embedding"].astype(jnp.float32)
    nb = emb_tbl.shape[0]                        # num_behavior + 1
    nb_pad = _round_up(nb, 8)
    emb_proj = jnp.matmul(emb_tbl, wi_b.astype(jnp.float32),
                          precision=jax.lax.Precision.HIGHEST)       # (nb, EF)
    emb_proj = jnp.pad(emb_proj, ((0, nb_pad - nb), (0, ef_pad - ef)))

    # Pre-cast all matmul operand weights once, wrapper-side.
    wi_h = wi_h.astype(matmul_dtype)
    wo_all = wo_all.astype(matmul_dtype)
    emb_proj = emb_proj.astype(matmul_dtype)

    # Column -> expert map (padded columns map to expert `num_experts`, which
    # never matches a valid position id).
    col2expert = (jnp.arange(ef_pad, dtype=jnp.int32) // d_ff).reshape(1, ef_pad)

    lnw = params["ln_weight"].reshape(1, D).astype(jnp.float32)

    # --- token tiling: big tiles, >=2 grid steps when possible (v7x), padded
    # wrapper-side to a whole number of tiles (no ragged partial tiles).
    token_tile = max(8, (int(token_tile) // 8) * 8)
    n8 = _round_up(N, 8)
    if n8 <= 2 * token_tile:
        tn = max(8, _round_up(pl.cdiv(n8, 2), 8))
    else:
        tn = token_tile
    grid_n = pl.cdiv(n8, tn)
    n_padded = grid_n * tn
    pad_rows = n_padded - N

    h2 = jnp.pad(hidden.reshape(N, D), ((0, pad_rows), (0, 0)))
    pos2 = jnp.pad(position_index.reshape(N).astype(jnp.int32), (0, pad_rows),
                   constant_values=num_experts).reshape(n_padded, 1)
    beh2 = jnp.pad(behavior_index.reshape(N).astype(jnp.int32), (0, pad_rows),
                   constant_values=0).reshape(n_padded, 1)

    kernel = functools.partial(_pba_ff_kernel, eps=eps,
                               matmul_dtype=matmul_dtype)

    w_itemsize = np.dtype(matmul_dtype).itemsize
    h_itemsize = np.dtype(hidden.dtype).itemsize
    flops = 2 * n_padded * ef_pad * (2 * D + nb_pad)
    bytes_accessed = (
        n_padded * D * h_itemsize * 2                    # hidden in + out
        + n_padded * 2 * 4                               # pos + beh
        + (D * ef_pad + nb_pad * ef_pad + ef_pad * D) * w_itemsize
        + D * 4 + ef_pad * 4)                            # ln weight + col map

    out = pl.pallas_call(
        kernel,
        out_shape=jax.ShapeDtypeStruct((n_padded, D), hidden.dtype),
        grid_spec=pltpu.PrefetchScalarGridSpec(
            num_scalar_prefetch=0,
            grid=(grid_n,),
            in_specs=[
                pl.BlockSpec((tn, D), lambda n: (n, 0)),            # hidden
                pl.BlockSpec((tn, 1), lambda n: (n, 0)),            # position
                pl.BlockSpec((tn, 1), lambda n: (n, 0)),            # behavior
                pl.BlockSpec((1, D), lambda n: (0, 0)),             # ln weight
                pl.BlockSpec((1, ef_pad), lambda n: (0, 0)),        # col->expert
                pl.BlockSpec((D, ef_pad), lambda n: (0, 0)),        # Wi (hidden)
                pl.BlockSpec((nb_pad, ef_pad), lambda n: (0, 0)),   # emb_proj
                pl.BlockSpec((ef_pad, D), lambda n: (0, 0)),        # Wo stacked
            ],
            out_specs=pl.BlockSpec((tn, D), lambda n: (n, 0)),
        ),
        compiler_params=pltpu.CompilerParams(
            dimension_semantics=("parallel",),
            vmem_limit_bytes=32 * 1024 * 1024),
        cost_estimate=pl.CostEstimate(
            flops=flops, transcendentals=n_padded,
            bytes_accessed=bytes_accessed),
    )(h2, pos2, beh2, lnw, col2expert, wi_h, emb_proj, wo_all)

    return out[:N].reshape(B, S, D)


# ------------------------- plain-JAX reference ------------------------------


def pba_layer_ff_ref(hidden, position_index, behavior_index, params, *, eps=1e-6):
    h = hidden.astype(jnp.float32)
    var = jnp.mean(h * h, axis=-1, keepdims=True)
    normed = h * jax.lax.rsqrt(var + eps) * params["ln_weight"]
    emb = params["behavior_embedding"][behavior_index]
    x = jnp.concatenate([normed, emb], axis=-1)
    next_states = jnp.zeros_like(hidden)
    num_experts = params["wi"].shape[0]
    for e in range(num_experts):
        mid = jnp.maximum(
            jnp.matmul(x, params["wi"][e], precision=jax.lax.Precision.HIGHEST),
            0.0)
        y = jnp.matmul(mid, params["wo"][e],
                       precision=jax.lax.Precision.HIGHEST)
        mask = (position_index == e)[..., None]
        next_states = jnp.where(mask, y, next_states)
    return hidden + next_states


# --------------------------------- main --------------------------------------


if __name__ == "__main__":
    # small config
    B, S = 2, 8
    d_model, d_ff = 32, 64
    behavior_embedding_dim = 16
    num_positions, num_behavior = 4, 4
    num_experts = num_positions + 1          # 5

    key = jax.random.PRNGKey(0)
    k_h, k_pos, k_beh, k_wi, k_wo, k_emb, k_ln = jax.random.split(key, 7)

    hidden = jax.random.normal(k_h, (B, S, d_model), dtype=jnp.float32)
    position_index = jax.random.randint(k_pos, (B, S), 0, num_experts,
                                        dtype=jnp.int32)
    behavior_index = jax.random.randint(k_beh, (B, S), 0, num_behavior + 1,
                                        dtype=jnp.int32)

    # deterministic synthetic parameters (torch Linear is x @ W.T, so we build
    # the (in, out)-shaped matrices the kernel consumes directly)
    params = {
        "wi": 0.05 * jax.random.normal(
            k_wi, (num_experts, d_model + behavior_embedding_dim, d_ff),
            dtype=jnp.float32),
        "wo": 0.05 * jax.random.normal(
            k_wo, (num_experts, d_ff, d_model), dtype=jnp.float32),
        "behavior_embedding": 0.1 * jax.random.normal(
            k_emb, (num_behavior + 1, behavior_embedding_dim),
            dtype=jnp.float32),
        "ln_weight": 1.0 + 0.01 * jax.random.normal(
            k_ln, (d_model,), dtype=jnp.float32),
    }

    ref = pba_layer_ff_ref(hidden, position_index, behavior_index, params)

    # f32 MXU-operand path (near-exact vs the reference)
    out_f32 = jax.jit(functools.partial(pba_layer_ff,
                                        matmul_dtype=jnp.float32))(
        hidden, position_index, behavior_index, params)
    out_f32 = jax.block_until_ready(out_f32)
    assert out_f32.shape == (B, S, d_model)
    err_f32 = float(jnp.max(jnp.abs(out_f32 - ref)))
    assert err_f32 < 1e-3, f"f32 path mismatch vs reference (max abs err {err_f32})"

    # bf16 MXU-operand path (default; f32 accumulation everywhere)
    out_bf16 = jax.jit(pba_layer_ff)(hidden, position_index, behavior_index,
                                     params)
    out_bf16 = jax.block_until_ready(out_bf16)
    assert out_bf16.shape == (B, S, d_model)
    err_bf16 = float(jnp.max(jnp.abs(out_bf16 - ref)))
    assert err_bf16 < 5e-2, f"bf16 path mismatch vs reference (max abs err {err_bf16})"

    print("KERNEL_OK")
</pallas_src>

<mosaic_0001>
module attributes {stable_mosaic.version = 11 : i64} {
  func.func @_pba_ff_kernel(%arg0: i32, %arg1: memref<8x32xf32, #tpu.memory_space<vmem>>, %arg2: memref<8x1xi32, #tpu.memory_space<vmem>>, %arg3: memref<8x1xi32, #tpu.memory_space<vmem>>, %arg4: memref<1x32xf32, #tpu.memory_space<vmem>>, %arg5: memref<1x384xi32, #tpu.memory_space<vmem>>, %arg6: memref<32x384xf32, #tpu.memory_space<vmem>>, %arg7: memref<8x384xf32, #tpu.memory_space<vmem>>, %arg8: memref<384x32xf32, #tpu.memory_space<vmem>>, %arg9: memref<8x32xf32, #tpu.memory_space<vmem>>) attributes {dimension_semantics = [#tpu.dimension_semantics<parallel>], iteration_bounds = array<i64: 2>, scalar_prefetch = 0 : i64, scratch_operands = 0 : i64, tpu.core_type = #tpu.core_type<tc>, window_params = [{transform_indices = @transform_0, window_bounds = array<i64: 8, 32>}, {transform_indices = @transform_1, window_bounds = array<i64: 8, 1>}, {transform_indices = @transform_2, window_bounds = array<i64: 8, 1>}, {pipeline_mode = #tpu.pipeline_mode<synchronous>, transform_indices = @transform_3, window_bounds = array<i64: 1, 32>}, {pipeline_mode = #tpu.pipeline_mode<synchronous>, transform_indices = @transform_4, window_bounds = array<i64: 1, 384>}, {pipeline_mode = #tpu.pipeline_mode<synchronous>, transform_indices = @transform_5, window_bounds = array<i64: 32, 384>}, {pipeline_mode = #tpu.pipeline_mode<synchronous>, transform_indices = @transform_6, window_bounds = array<i64: 8, 384>}, {pipeline_mode = #tpu.pipeline_mode<synchronous>, transform_indices = @transform_7, window_bounds = array<i64: 384, 32>}, {transform_indices = @transform_8, window_bounds = array<i64: 8, 32>}]} {
    %c0 = arith.constant 0 : index
    %c0_0 = arith.constant 0 : index
    %0 = vector.load %arg1[%c0, %c0_0] : memref<8x32xf32, #tpu.memory_space<vmem>>, vector<8x32xf32>
    %1 = arith.mulf %0, %0 : vector<8x32xf32>
    %cst = arith.constant dense<0.000000e+00> : vector<8xf32>
    %2 = vector.multi_reduction <add>, %1, %cst [1] : vector<8x32xf32> to vector<8xf32>
    %3 = vector.shape_cast %2 : vector<8xf32> to vector<8x1xf32>
    %cst_1 = arith.constant 3.200000e+01 : f32
    %4 = vector.broadcast %cst_1 : f32 to vector<8x1xf32>
    %5 = arith.divf %3, %4 : vector<8x1xf32>
    %cst_2 = arith.constant 9.99999997E-7 : f32
    %6 = vector.broadcast %cst_2 : f32 to vector<8x1xf32>
    %7 = arith.addf %5, %6 : vector<8x1xf32>
    %8 = math.rsqrt %7 : vector<8x1xf32>
    %9 = vector.broadcast %8 : vector<8x1xf32> to vector<8x32xf32>
    %10 = arith.mulf %0, %9 : vector<8x32xf32>
    %c0_3 = arith.constant 0 : index
    %c0_4 = arith.constant 0 : index
    %11 = vector.load %arg4[%c0_3, %c0_4] : memref<1x32xf32, #tpu.memory_space<vmem>>, vector<1x32xf32>
    %12 = vector.broadcast %11 : vector<1x32xf32> to vector<8x32xf32>
    %13 = arith.mulf %10, %12 : vector<8x32xf32>
    %14 = tpu.iota {dimensions = array<i32: 1>} : vector<8x8xi32>
    %c0_5 = arith.constant 0 : index
    %c0_6 = arith.constant 0 : index
    %15 = vector.load %arg3[%c0_5, %c0_6] : memref<8x1xi32, #tpu.memory_space<vmem>>, vector<8x1xi32>
    %16 = vector.broadcast %15 : vector<8x1xi32> to vector<8x8xi32>
    %17 = arith.cmpi eq, %14, %16 : vector<8x8xi32>
    %18 = arith.extui %17 : vector<8x8xi1> to vector<8x8xi32>
    %19 = arith.sitofp %18 : vector<8x8xi32> to vector<8x8xf32>
    %c0_7 = arith.constant 0 : index
    %c0_8 = arith.constant 0 : index
    %20 = vector.load %arg6[%c0_7, %c0_8] : memref<32x384xf32, #tpu.memory_space<vmem>>, vector<32x384xf32>
    %cst_9 = arith.constant dense<0.000000e+00> : vector<8x384xf32>
    %21 = tpu.matmul %13, %20, %cst_9 {dimension_numbers = #tpu.dot_dimension_numbers<[1], [0], [0], [1], [0, 0, 1, 1], [], []>} : vector<8x32xf32>, vector<32x384xf32>, vector<8x384xf32> -> vector<8x384xf32>
    %c0_10 = arith.constant 0 : index
    %c0_11 = arith.constant 0 : index
    %22 = vector.load %arg7[%c0_10, %c0_11] : memref<8x384xf32, #tpu.memory_space<vmem>>, vector<8x384xf32>
    %cst_12 = arith.constant dense<0.000000e+00> : vector<8x384xf32>
    %23 = tpu.matmul %19, %22, %cst_12 {dimension_numbers = #tpu.dot_dimension_numbers<[1], [0], [0], [1], [0, 0, 1, 1], [], []>} : vector<8x8xf32>, vector<8x384xf32>, vector<8x384xf32> -> vector<8x384xf32>
    %24 = arith.addf %21, %23 : vector<8x384xf32>
    %c0_13 = arith.constant 0 : index
    %c0_14 = arith.constant 0 : index
    %25 = vector.load %arg5[%c0_13, %c0_14] : memref<1x384xi32, #tpu.memory_space<vmem>>, vector<1x384xi32>
    %c0_15 = arith.constant 0 : index
    %c0_16 = arith.constant 0 : index
    %26 = vector.load %arg2[%c0_15, %c0_16] : memref<8x1xi32, #tpu.memory_space<vmem>>, vector<8x1xi32>
    %27 = vector.broadcast %25 : vector<1x384xi32> to vector<8x384xi32>
    %28 = vector.broadcast %26 : vector<8x1xi32> to vector<8x384xi32>
    %29 = arith.cmpi eq, %27, %28 : vector<8x384xi32>
    %cst_17 = arith.constant 0.000000e+00 : f32
    %30 = vector.broadcast %cst_17 : f32 to vector<8x384xf32>
    %31 = arith.cmpf ogt, %24, %30 : vector<8x384xf32>
    %32 = arith.andi %29, %31 : vector<8x384xi1>
    %cst_18 = arith.constant 0.000000e+00 : f32
    %33 = vector.broadcast %cst_18 : f32 to vector<8x384xf32>
    %34 = arith.select %32, %24, %33 : vector<8x384xi1>, vector<8x384xf32>
    %c0_19 = arith.constant 0 : index
    %c0_20 = arith.constant 0 : index
    %35 = vector.load %arg8[%c0_19, %c0_20] : memref<384x32xf32, #tpu.memory_space<vmem>>, vector<384x32xf32>
    %cst_21 = arith.constant dense<0.000000e+00> : vector<8x32xf32>
    %36 = tpu.matmul %34, %35, %cst_21 {dimension_numbers = #tpu.dot_dimension_numbers<[1], [0], [0], [1], [0, 0, 1, 1], [], []>} : vector<8x384xf32>, vector<384x32xf32>, vector<8x32xf32> -> vector<8x32xf32>
    %37 = arith.addf %0, %36 : vector<8x32xf32>
    %c0_22 = arith.constant 0 : index
    %c0_23 = arith.constant 0 : index
    %38 = vector.load %arg9[%c0_22, %c0_23] : memref<8x32xf32, #tpu.memory_space<vmem>>, vector<8x32xf32>
    tpu.vector_store %arg9[%c0_22, %c0_23], %37 {strides = array<i32>} : memref<8x32xf32, #tpu.memory_space<vmem>>, vector<8x32xf32>,
    return
  }
  func.func @transform_0(%arg0: i32) -> (i32, i32) {
    %c0_i32 = arith.constant 0 : i32
    %c0_i32_0 = arith.constant 0 : i32
    return %arg0, %c0_i32 : i32, i32
  }
  func.func @transform_1(%arg0: i32) -> (i32, i32) {
    %c0_i32 = arith.constant 0 : i32
    %c0_i32_0 = arith.constant 0 : i32
    return %arg0, %c0_i32 : i32, i32
  }
  func.func @transform_2(%arg0: i32) -> (i32, i32) {
    %c0_i32 = arith.constant 0 : i32
    %c0_i32_0 = arith.constant 0 : i32
    return %arg0, %c0_i32 : i32, i32
  }
  func.func @transform_3(%arg0: i32) -> (i32, i32) {
    %c0_i32 = arith.constant 0 : i32
    %c0_i32_0 = arith.constant 0 : i32
    %c0_i32_1 = arith.constant 0 : i32
    return %c0_i32, %c0_i32_0 : i32, i32
  }
  func.func @transform_4(%arg0: i32) -> (i32, i32) {
    %c0_i32 = arith.constant 0 : i32
    %c0_i32_0 = arith.constant 0 : i32
    %c0_i32_1 = arith.constant 0 : i32
    return %c0_i32, %c0_i32_0 : i32, i32
  }
  func.func @transform_5(%arg0: i32) -> (i32, i32) {
    %c0_i32 = arith.constant 0 : i32
    %c0_i32_0 = arith.constant 0 : i32
    %c0_i32_1 = arith.constant 0 : i32
    return %c0_i32, %c0_i32_0 : i32, i32
  }
  func.func @transform_6(%arg0: i32) -> (i32, i32) {
    %c0_i32 = arith.constant 0 : i32
    %c0_i32_0 = arith.constant 0 : i32
    %c0_i32_1 = arith.constant 0 : i32
    return %c0_i32, %c0_i32_0 : i32, i32
  }
  func.func @transform_7(%arg0: i32) -> (i32, i32) {
    %c0_i32 = arith.constant 0 : i32
    %c0_i32_0 = arith.constant 0 : i32
    %c0_i32_1 = arith.constant 0 : i32
    return %c0_i32, %c0_i32_0 : i32, i32
  }
  func.func @transform_8(%arg0: i32) -> (i32, i32) {
    %c0_i32 = arith.constant 0 : i32
    %c0_i32_0 = arith.constant 0 : i32
    return %arg0, %c0_i32 : i32, i32
  }
}

</mosaic_0001>

<bundles_post_ra>
// kernel: pba_layer_ff.1
= control target key start
LH: loop header
LB: loop body
LE: loop exit
PB: predicated region body
PF: predicated region fallthrough
CT: control target
= control target key end

     0   :  { %13 = vsyncpa [#allocation3], 0  ;;  %s1601_s0 = inlined_call_operand.vmem [shape: f32[16,32], index: 0, kind: input, shape index: {}]   ;;  %s1602_s1 = inlined_call_operand.vmem [shape: s32[16,1], index: 1, kind: input, shape index: {}]   ;;  %s1603_s2 = inlined_call_operand.vmem [shape: s32[16,1], index: 2, kind: input, shape index: {}]   ;;  %s1604_s3 = inlined_call_operand.vmem [shape: f32[1,32], index: 3, kind: input, shape index: {}]   ;;  %s1605_s4 = inlined_call_operand.vmem [shape: s32[1,384], index: 4, kind: input, shape index: {}]   ;;  %s1606_s5 = inlined_call_operand.vmem [shape: f32[32,384], index: 5, kind: input, shape index: {}]   ;;  %s1607_s6 = inlined_call_operand.vmem [shape: f32[8,384], index: 6, kind: input, shape index: {}]   ;;  %s1608_s7 = inlined_call_operand.vmem [shape: f32[384,32], index: 7, kind: input, shape index: {}]   ;;  %s1609_s8 = inlined_call_operand.hbm [shape: f32[16,32], index: 8, kind: output, shape index: {}]  }
   0x1   :  { %15 = vsyncpa [#allocation3 + $0x1], 0  ;;  %s1271_s27 = smov 0   ;;  %s1273_s28 = smov 0  }
   0x2   :  { %s1275_s29 = smov 0   ;;  %s1277_s30 = smov 0  }
   0x3 LB: > { %s1292_s9 = sadd.s32 4294967295, %s1220_s30   ;;  %s983_s10 = sadd.s32 4294967294, %s1220_s30   ;;  %s1220_s30 = sphi %s1277_s30, %s1615_s30   ;;  %s1216_s29 = sphi %s1275_s29, %s1614_s29   ;;  %s1212_s28 = sphi %s1273_s28, %s1613_s28   ;;  %s1208_s27 = sphi %s1271_s27, %s1612_s27  }
   0x4   : > { %s1296_s11 = sadd.s32 1, %s1220_s30   ;;  %s211_s12 = sadd.s32 1, %s1216_s29 }
   0x5   : > { %s208_s13 = ssub.s32 %s1220_s30, %s1296_s11  ;;  %p221_p0 = scmp.ne.s32.totalorder %s1216_s29, %s1212_s28 }
   0x6   : > { %p209_p1 = scmp.eq.s32.totalorder %s208_s13, 0  ;;  %p222_p2 = scmp.eq.s32.totalorder %s1292_s9, 1 }
   0x7   : > { %p227_p3 = scmp.ne.s32.totalorder %s1212_s28, %s1208_s27  ;;  %p228_p4 = scmp.eq.s32.totalorder %s983_s10, 1 }
   0x8   : > { %s1307_s14 = scalar_select %p209_p1, %s1216_s29, %s211_s12  }
   0x9   : > { %p1309_p5 = por %p222_p2, %p221_p0  ;;  %p1313_p6 = por %p228_p4, %p227_p3 }
   0xa   : > { %p986_p7 = scmp.ge.s32.totalorder %s1220_s30, 1  ;;  %p282_p8 = scmp.lt.s32.totalorder %s1220_s30, 3 }
   0xc   : > { %p283_p9 = pnand %p986_p7, %p282_p8 }
   0xd   : > { %p323_p10 = scmp.lt.s32.totalorder (!%p283_p9), %s1292_s9, 1  ;;  %s320_s12 = sand.u32 (!%p283_p9), 1, %s1212_s28  }
   0xe   : > { %286 = sbr.rel (%p283_p9) target bundleno = 601 (0x259), region = 52  ;;  %s987_s13 = sshll.u32 (!%p283_p9), %s320_s12, 3 }
   0xf   : > { %s322_s19 = scalar_lea.vmem (!%p283_p9), [#allocation2], %s987_s13  ;;  %s1225_s26 = smov (!%p283_p9), [#allocation2]  }
  0x10   : > { %s900_s20 = sshll.u32 (!%p283_p9), %s322_s19, 4  ;;  %s901_s20 = int_to_ptr.vmem [resolvable:$true] %s900_s20 }
  0x11   : > { %s1160_s25 = scalar_lea.vmem (!%p283_p9), %s901_s20, 128 }
  0x12   : > { %p1161_p11 = scmp.ne.s32.totalorder (!%p283_p9), %s901_s20, %s1160_s25 }
  0x13   : > { %v1222_v0 = vmov 0   ;;  %s324_s17 = scalar_select %p323_p10, %s1292_s9, 1  ;;  %vm337_vm0 = vcmask 261120   ;;  %v1223_v4 = vmov 0.0   ;;  %v376_v6 = vld [vmem:[%s1607_s6 + $0x8] sm:$0xff]  ;;  %v375_v7 = vld [vmem:[%s1607_s6] sm:$0xff]  ;;  %v354_v13 = vlaneseq }
  0x14   : > { %1156 = vset.pattern.permute.xlu0 %v1222_v0  ;;  %1157 = vset.pattern.permute.xlu1 %v1222_v0  ;;  %v377_v8 = vld [vmem:[%s1607_s6 + $0x10] sm:$0xff]  ;;  %vm1224_vm1 = vmmov 0   ;;  %vm378_vm2 = vcmask 64512   ;;  %v372_v17 = vld [vmem:[%s1606_s5 + $0x48] sm:$0xff]  ;;  %v374_v18 = vld [vmem:[%s1606_s5 + $0x58] sm:$0xff]  ;;  %p1162_p12 = pnand %p1161_p11, %p1309_p5 }
  0x15   : > { %s988_s18 = sshll.u32 %s324_s17, 3  ;;  %1063 = vmatprep.subr.mxu1 %v1223_v4  ;;  %446 = vmatprep.mubr.f32.mxu0 %v1223_v4  ;;  %v373_v9 = vld [vmem:[%s1606_s5 + $0x50] sm:$0xff]  ;;  %v355_v15 = vand.u32 127, %v354_v13  ;;  %v370_v20 = vld [vmem:[%s1606_s5 + $0x38] sm:$0xff]  ;;  %v371_v22 = vld [vmem:[%s1606_s5 + $0x40] sm:$0xff]  ;;  %s1001_s17 = sshll.u32 %s1292_s9, 7 }
  0x16   : > { %s326_s21 = scalar_lea.vmem %s1601_s0, %s988_s18  ;;  %s334_s24 = scalar_lea.vmem %s1603_s2, %s988_s18  ;;  %412 = vmatprep.subr.mxu0 %v376_v6  ;;  %1064 = vmatpush3.msra.mxu1 %v377_v8  ;;  %v369_v21 = vld [vmem:[%s1606_s5 + $0x30] sm:$0xff]  ;;  %v367_v23 = vld [vmem:[%s1606_s5 + $0x20] sm:$0xff]  ;;  %v366_v24 = vld [vmem:[%s1606_s5 + $0x18] sm:$0xff] }
  0x17   : > { %v1324_v1 = vld [vmem:[%s326_s21] sm:$0xff]  ;;  %413 = vmatpush1.msra.mxu0 %v375_v7  ;;  %1065 = vmatprep.mubr.msk.f32.mxu1 %vm1224_vm1, %v1223_v4  ;;  %s330_s23 = scalar_lea.vmem %s1602_s1, %s988_s18  ;;  %v368_v25 = vld [vmem:[%s1606_s5 + $0x28] sm:$0xff]  ;;  %v365_v28 = vld [vmem:[%s1606_s5 + $0x10] sm:$0xff]  ;;  %p1163_p13 = pneg %p1162_p12 }
  0x18   : > { %v336_v2 = vmul.f32 %v1324_v1, %v1324_v1  ;;  %v356_v5 = vld [vmem:[%s334_s24] sm:$0xff]  ;;  %550 = vmatprep.subr.mxu0 %v373_v9  ;;  %1068 = vmatprep.subr.mxu1 %v1223_v4  ;;  %v364_v26 = vld [vmem:[%s1606_s5 + $0x8] sm:$0xff]  ;;  %v727_v29 = vld [vmem:[%s1608_s7 + $0xf8] sm:$0xff]  ;;  %s887_s24 = scalar_lea.sflag [#allocation3], %s320_s12  ;;  %s1164_s9 = sshll.u32 %s1225_s26, 4  ;;  %s1165_s9 = int_to_ptr.vmem [resolvable:$false] %s1164_s9 }
  0x19   : > { %v668_v10 = vld [vmem:[%s330_s23] sm:$0xff]  ;;  %v743_v34 = vld [vmem:[%s1608_s7 + $0x178] sm:$0xff]  ;;  %v726_v36 = vld [vmem:[%s1608_s7 + $0xf0] sm:$0xff]  ;;  %s898_s23 = scalar_lea.hbm %s1609_s8, %s1001_s17  ;;  %s1166_s10 = scalar_lea.vmem %s1165_s9, 256 }
  0x1a   : > { %v338_v3 = vsel %vm337_vm0, %v336_v2, 0.0  ;;  %682 = vperm.xlu1 %1157, %v668_v10   ;;  %v363_v27 = vld [vmem:[%s1606_s5] sm:$0xff]  ;;  %v711_v35 = vld [vmem:[%s1608_s7 + $0x78] sm:$0xff]  ;;  %v742_v37 = vld [vmem:[%s1608_s7 + $0x170] sm:$0xff]  ;;  %p1167_p0 = scmp.lt.s32.totalorder %s901_s20, %s1165_s9  ;;  %p1168_p1 = scmp.lt.s32.totalorder %s1166_s10, %s1160_s25 }
  0x1b   : > { %339 = vadd.xlane.f32.xlu0 %v338_v3  ;;  %v991_v31 = vld [vmem:[%s1604_s3] ss:$0 sm:$0xff]  ;;  %v710_v38 = vld [vmem:[%s1608_s7 + $0x70] sm:$0xff]  ;;  %v725_v39 = vld [vmem:[%s1608_s7 + $0xe8] sm:$0xff] }
  0x1c   : > { %v741_v40 = vld [vmem:[%s1608_s7 + $0x168] sm:$0xff]  ;;  %v724_v42 = vld [vmem:[%s1608_s7 + $0xe0] sm:$0xff]  ;;  %v723_v45 = vld [vmem:[%s1608_s7 + $0xd8] sm:$0xff]  ;;  %p1169_p2 = por %p1168_p1, %p1167_p0 }
  0x1d   : > { %v709_v41 = vld [vmem:[%s1608_s7 + $0x68] sm:$0xff]  ;;  %v740_v43 = vld [vmem:[%s1608_s7 + $0x160] sm:$0xff]  ;;  %v739_v46 = vld [vmem:[%s1608_s7 + $0x158] sm:$0xff] }
  0x1e   : > { %v708_v44 = vld [vmem:[%s1608_s7 + $0x60] sm:$0xff]  ;;  %v707_v47 = vld [vmem:[%s1608_s7 + $0x58] sm:$0xff]  ;;  %v722_v48 = vld [vmem:[%s1608_s7 + $0xd0] sm:$0xff]  ;;  %p1170_p3 = pnand %p1169_p2, %p1163_p13 }
  0x1f   : > { %v738_v49 = vld [vmem:[%s1608_s7 + $0x150] sm:$0xff]  ;;  %v721_v51 = vld [vmem:[%s1608_s7 + $0xc8] sm:$0xff]  ;;  %v720_v54 = vld [vmem:[%s1608_s7 + $0xc0] sm:$0xff] }
  0x20   : > { %v706_v50 = vld [vmem:[%s1608_s7 + $0x50] sm:$0xff]  ;;  %v737_v52 = vld [vmem:[%s1608_s7 + $0x148] sm:$0xff]  ;;  %v736_v55 = vld [vmem:[%s1608_s7 + $0x140] sm:$0xff] }
  0x21   : > { %v705_v53 = vld [vmem:[%s1608_s7 + $0x48] sm:$0xff]  ;;  %v735_v56 = vld [vmem:[%s1608_s7 + $0x138] sm:$0xff]  ;;  %v704_v57 = vld [vmem:[%s1608_s7 + $0x40] sm:$0xff] }
  0x22   : > { %v719_v58 = vld [vmem:[%s1608_s7 + $0xb8] sm:$0xff]  ;;  %v734_v59 = vld [vmem:[%s1608_s7 + $0x130] sm:$0xff]  ;;  %v733_v62 = vld [vmem:[%s1608_s7 + $0x128] sm:$0xff] }
  0x23   : > { %v703_v60 = vld [vmem:[%s1608_s7 + $0x38] sm:$0xff]  ;;  %v718_v61 = vld [vmem:[%s1608_s7 + $0xb0] sm:$0xff]  ;;  %v717_v0 = vld [vmem:[%s1608_s7 + $0xa8] sm:$0xff] }
  0x24   : > { %v702_v63 = vld [vmem:[%s1608_s7 + $0x30] sm:$0xff]  ;;  %v732_v2 = vld [vmem:[%s1608_s7 + $0x120] sm:$0xff]  ;;  %v701_v3 = vld [vmem:[%s1608_s7 + $0x28] sm:$0xff] }
  0x25   : > { %v716_v6 = vld [vmem:[%s1608_s7 + $0xa0] sm:$0xff]  ;;  %v715_v8 = vld [vmem:[%s1608_s7 + $0x98] sm:$0xff]  ;;  %v730_v9 = vld [vmem:[%s1608_s7 + $0x110] sm:$0xff] }
  0x26   : > { %v700_v7 = vld [vmem:[%s1608_s7 + $0x20] sm:$0xff]  ;;  %v699_v10 = vld [vmem:[%s1608_s7 + $0x18] sm:$0xff] }
  0x31   : > { %358 = vperm.xlu0 %1156, %v356_v5   ;;  %v731_v5 = vld [vmem:[%s1608_s7 + $0x118] sm:$0xff] }
  0xa4   : > { %v340_v11 = vpop.xlane.xlu0 %339 }
  0xa5   : > { %v342_v12 = vmul.f32 0.03125, %v340_v11  ;;  %v714_v11 = vld [vmem:[%s1608_s7 + $0x90] sm:$0xff] }
  0xa7   : > { %v343_v14 = vadd.f32 1e-06, %v342_v12  ;;  %v729_v12 = vld [vmem:[%s1608_s7 + $0x108] sm:$0xff] }
  0xa9   : > { %1158 = vrsqrt.f32 %v343_v14  ;;  %v698_v14 = vld [vmem:[%s1608_s7 + $0x10] sm:$0xff] }
  0xac   : > { %v359_v16 = vpop.permute.xlu0 %358 }
  0xad   : > { %vm360_vm3 = vcmp.eq.s32.totalorder %v355_v15, %v359_v16  ;;  %v713_v15 = vld [vmem:[%s1608_s7 + $0x88] sm:$0xff]  ;;  %v728_v16 = vld [vmem:[%s1608_s7 + $0x100] sm:$0xff] }
  0xae   : > { %v992_v19 = vsel %vm360_vm3, 1.0, %v1223_v4 }
  0xaf   : > { %993 = vmatmul.mubr.msk.f32.vlgmr.msra.gmra.mxu0 %vm378_vm2, %v992_v19  ;;  %1066 = vmatmul.mubr.msk.f32.vlgmr.msra.gmra.mxu1 %vm378_vm2, %v992_v19 }
  0xb0   : > { %551 = vmatpush1.msra.mxu0 %v372_v17  ;;  %1069 = vmatpush3.msra.mxu1 %v374_v18  ;;  %v697_v17 = vld [vmem:[%s1608_s7 + $0x8] sm:$0xff]  ;;  %v712_v18 = vld [vmem:[%s1608_s7 + $0x80] sm:$0xff] }
  0xb1   : > { %552 = vmatprep.subr.mxu0 %v370_v20  ;;  %1070 = vmatprep.subr.mxu1 %v1223_v4  ;;  %v670_v20 = vshrl.u32 %v354_v13, 7 }
  0xb2   : > { %553 = vmatpush1.msra.mxu0 %v369_v21  ;;  %1071 = vmatpush3.msra.mxu1 %v371_v22 }
  0xb3   : > { %554 = vmatprep.subr.mxu0 %v367_v23  ;;  %1072 = vmatprep.subr.mxu1 %v1223_v4  ;;  %v679_v23 = vsub.s32 2, %v670_v20 }
  0xb4   : > { %555 = vmatpush1.msra.mxu0 %v366_v24  ;;  %1073 = vmatpush3.msra.mxu1 %v368_v25  ;;  %v667_v24 = vld [vmem:[%s1605_s4] sm:$0x7]  ;;  %v675_v25 = vsub.s32 1, %v670_v20 }
  0xb5   : > { %556 = vmatprep.subr.mxu0 %v364_v26  ;;  %1074 = vmatprep.subr.mxu1 %v1223_v4  ;;  %v671_v26 = vsub.s32 0, %v670_v20 }
  0xb6   : > { %v1159_v30 = vpop.eup %1158  ;;  %557 = vmatpush1.msra.mxu0 %v363_v27  ;;  %590 = vmatprep.mubr.f32.mxu0 %v1223_v4 }
  0xb7   : > { %1075 = vmatpush3.msra.mxu1 %v365_v28  ;;  %1076 = vmatprep.mubr.msk.f32.mxu1 %vm1224_vm1, %v1223_v4  ;;  %v345_v32 = vmul.f32 %v1159_v30, %v1324_v1  ;;  %v680_v28 = vrot.slane %v667_v24, %v679_v23  ;;  %v683_v30 = vpop.permute.xlu1 %682 }
  0xb8   : > { %1079 = vmatprep.subr.mxu1 %v1223_v4  ;;  %1011 = vmatprep.subr.mxu0 %v727_v29  ;;  %v676_v29 = vrot.slane %v667_v24, %v675_v25 }
  0xb9   : > { %v353_v33 = vmul.f32 %v991_v31, %v345_v32  ;;  %vm686_vm4 = vcmp.eq.s32.totalorder %v680_v28, %v683_v30 }
  0xba   : > { %vm685_vm6 = vcmp.eq.s32.totalorder %v676_v29, %v683_v30 }
  0xbb   : > { %995 = vmatmul.mubr.msk.f32.vlgmr.msra.gmra.mxu0 %vm337_vm0, %v353_v33  ;;  %1077 = vmatmul.mubr.msk.f32.vlgmr.msra.gmra.mxu1 %vm337_vm0, %v353_v33  ;;  %v672_v33 = vrot.slane %v667_v24, %v671_v26 }
  0xbc   : > { %1080 = vmatpush3.msra.mxu1 %v743_v34  ;;  %1012 = vmatpush3.msra.mxu0 %v711_v35 }
  0xbd   : > { %1081 = vmatprep.subr.mxu1 %v1223_v4  ;;  %1013 = vmatprep.subr.mxu0 %v726_v36  ;;  %vm684_vm8 = vcmp.eq.s32.totalorder %v672_v33, %v683_v30 }
  0xbe   : > { %1082 = vmatpush3.msra.mxu1 %v742_v37  ;;  %1014 = vmatpush3.msra.mxu0 %v710_v38 }
  0xbf   : > { %1083 = vmatprep.subr.mxu1 %v1223_v4  ;;  %1015 = vmatprep.subr.mxu0 %v725_v39 }
  0xc0   : > { %1084 = vmatpush3.msra.mxu1 %v741_v40  ;;  %1016 = vmatpush3.msra.mxu0 %v709_v41 }
  0xc1   : > { %1085 = vmatprep.subr.mxu1 %v1223_v4  ;;  %1017 = vmatprep.subr.mxu0 %v724_v42 }
  0xc2   : > { %1086 = vmatpush3.msra.mxu1 %v740_v43  ;;  %1018 = vmatpush3.msra.mxu0 %v708_v44 }
  0xc3   : > { %1087 = vmatprep.subr.mxu1 %v1223_v4  ;;  %1019 = vmatprep.subr.mxu0 %v723_v45 }
  0xc4   : > { %1088 = vmatpush3.msra.mxu1 %v739_v46  ;;  %1020 = vmatpush3.msra.mxu0 %v707_v47 }
  0xc5   : > { %1089 = vmatprep.subr.mxu1 %v1223_v4  ;;  %1021 = vmatprep.subr.mxu0 %v722_v48 }
  0xc6   : > { %1090 = vmatpush3.msra.mxu1 %v738_v49  ;;  %1022 = vmatpush3.msra.mxu0 %v706_v50 }
  0xc7   : > { %1091 = vmatprep.subr.mxu1 %v1223_v4  ;;  %1023 = vmatprep.subr.mxu0 %v721_v51 }
  0xc8   : > { %1092 = vmatpush3.msra.mxu1 %v737_v52  ;;  %1024 = vmatpush3.msra.mxu0 %v705_v53 }
  0xc9   : > { %1093 = vmatprep.subr.mxu1 %v1223_v4  ;;  %1025 = vmatprep.subr.mxu0 %v720_v54 }
  0xca   : > { %1094 = vmatpush3.msra.mxu1 %v736_v55  ;;  %1111 = vmatprep.mubr.msk.f32.mxu1 %vm1224_vm1, %v1223_v4 }
  0xcb   : > { %1095 = vmatprep.subr.mxu1 %v1223_v4  ;;  %1026 = vmatpush3.msra.mxu0 %v704_v57 }
  0xcc   : > { %1096 = vmatpush3.msra.mxu1 %v735_v56  ;;  %1027 = vmatprep.subr.mxu0 %v719_v58 }
  0xcd   : > { %1097 = vmatprep.subr.mxu1 %v1223_v4  ;;  %1028 = vmatpush3.msra.mxu0 %v703_v60 }
  0xce   : > { %1098 = vmatpush3.msra.mxu1 %v734_v59  ;;  %1029 = vmatprep.subr.mxu0 %v718_v61 }
  0xcf   : > { %1099 = vmatprep.subr.mxu1 %v1223_v4  ;;  %1030 = vmatpush3.msra.mxu0 %v702_v63 }
  0xd0   : > { %1100 = vmatpush3.msra.mxu1 %v733_v62  ;;  %1031 = vmatprep.subr.mxu0 %v717_v0 }
  0xd1   : > { %1101 = vmatprep.subr.mxu1 %v1223_v4  ;;  %1032 = vmatpush3.msra.mxu0 %v701_v3 }
  0xd2   : > { %1102 = vmatpush3.msra.mxu1 %v732_v2  ;;  %1033 = vmatprep.subr.mxu0 %v716_v6 }
  0xd3   : > { %1103 = vmatprep.subr.mxu1 %v1223_v4  ;;  %1034 = vmatpush3.msra.mxu0 %v700_v7 }
  0xd4   : > { %1104 = vmatpush3.msra.mxu1 %v731_v5  ;;  %1035 = vmatprep.subr.mxu0 %v715_v8 }
  0xd5   : > { %1105 = vmatprep.subr.mxu1 %v1223_v4  ;;  %1036 = vmatpush3.msra.mxu0 %v699_v10 }
  0xd6   : > { %1106 = vmatpush3.msra.mxu1 %v730_v9  ;;  %1037 = vmatprep.subr.mxu0 %v714_v11 }
  0xd7   : > { %1107 = vmatprep.subr.mxu1 %v1223_v4  ;;  %1038 = vmatpush3.msra.mxu0 %v698_v14 }
  0xd8   : > { %1108 = vmatpush3.msra.mxu1 %v729_v12  ;;  %1039 = vmatprep.subr.mxu0 %v713_v15 }
  0xd9   : > { %1109 = vmatprep.subr.mxu1 %v1223_v4  ;;  %1040 = vmatpush3.msra.mxu0 %v697_v17  ;;  %v696_v4 = vld [vmem:[%s1608_s7] sm:$0xff] }
  0xda   : > { %1110 = vmatpush3.msra.mxu1 %v728_v16  ;;  %1041 = vmatprep.subr.mxu0 %v712_v18 }
  0xdb   : > { %1042 = vmatpush3.msra.mxu0 %v696_v4 }
 0x16f   : > { %v519_v19 = vpop.f32.mrf.mxu1  ;;  %v448_v22 = vpop.f32.mrf.mxu0 }
 0x171   : > { %v1067_v21 = vpop.f32.mrf.mxu1  ;;  %v450_v27 = vpop.f32.mrf.mxu0 }
 0x17b   : > { %v592_v31 = vpop.f32.mrf.mxu0  ;;  %v663_v32 = vpop.f32.mrf.mxu1 }
 0x17c   : > { %v593_v34 = vadd.f32 %v592_v31, %v448_v22  ;;  %v664_v35 = vadd.f32 %v663_v32, %v519_v19 }
 0x17d   : > { %v594_v13 = vpop.f32.mrf.mxu0  ;;  %v1078_v36 = vpop.f32.mrf.mxu1 }
 0x17e   : > { %vm689_vm5 = vcmp.gt.f32.partialorder %v664_v35, 0.0  ;;  %v595_v37 = vadd.f32 %v594_v13, %v450_v27  ;;  %vm687_vm7 = vcmp.gt.f32.partialorder %v593_v34, 0.0 }
 0x17f   : > { %vm692_vm9 = vmand %vm686_vm4, %vm689_vm5 }
 0x180   : > { %vm688_vm10 = vcmp.gt.f32.partialorder %v595_v37, 0.0  ;;  %1112 = vmatmul.mubr.msk.f32.vlgmr.msra.gmra.mxu1 %vm692_vm9, %v664_v35  ;;  %vm690_vm12 = vmand %vm684_vm8, %vm687_vm7 }
 0x181   : > { %vm691_vm11 = vmand %vm685_vm6, %vm688_vm10 }
 0x182   : > { %997 = vmatprep.mubr.msk.f32.mxu0 %vm691_vm11, %v595_v37 }
 0x183   : > { %998 = vmatmul.mubr.msk.f32.vlgmr.msra.gmra.mxu0 %vm690_vm12, %v593_v34 }
 0x240   : > { %v880_v38 = vpop.f32.mrf.mxu1 }
 0x242   : > { %v1113_v39 = vpop.f32.mrf.mxu1 }
 0x243   : > { %v1043_v40 = vpop.f32.mrf.mxu0 }
 0x245   : > { %v1044_v41 = vpop.f32.mrf.mxu0 }
 0x246   : > { %v1045_v42 = vadd.f32 %v1044_v41, %v1043_v40 }
 0x248   : > { %v881_v43 = vadd.f32 %v1045_v42, %v880_v38 }
 0x24a   : > { %v884_v44 = vadd.f32 %v881_v43, %v1324_v1 }
 0x24c   : > { %885 = vst.msk [vmem:[%s322_s19] sm:$0xff] %vm337_vm0, %v884_v44 }
 0x24d   : > { %1173 = shalt.err (!%p1170_p3)
}
 0x24e   : > { %s1174_s18 = scalar_lea.hbm %s898_s23, 128  ;;  %s1178_s17 = scalar_lea.hbm %s1609_s8, 256 }
 0x24f   : > { %p1175_p4 = scmp.ne.s32.totalorder %s898_s23, %s1174_s18  ;;  %p1179_p9 = scmp.lt.s32.totalorder %s898_s23, %s1609_s8 }
 0x250   : > { %p1180_p10 = scmp.lt.s32.totalorder %s1178_s17, %s1174_s18 }
 0x251   : > { %p1176_p7 = pnand %p1175_p4, %p1309_p5 }
 0x252   : > { %p1181_p11 = por %p1180_p10, %p1179_p9 }
 0x253   : > { %p1177_p8 = pneg %p1176_p7 }
 0x255   : > { %p1182_p12 = pnand %p1181_p11, %p1177_p8 }
 0x257   : > { %1185 = shalt.err (!%p1182_p12)
}
 0x258   : > { %1114 = dma.vmem_to_hbm [thread:$0]  (%p1309_p5), %s901_s20, 128, %s898_s23, %s887_s24  }
 0x259 PF: > { %p1120_p13 = scmp.ge.s32.totalorder %s1220_s30, 2  ;;  %s912_s22 = sand.u32 1, %s1208_s27  }
 0x25a   : > { %s913_s25 = scalar_lea.sflag [#allocation3], %s912_s22 }
 0x25b   : > { %p1117_p0 = pnand %p1120_p13, %p1313_p6 }
 0x25d   : > { %p1118_p1 = pneg %p1117_p0 }
 0x25f   : > { %1203 = dma.done.wait (%p1118_p1), %s913_s25, 128  }
 0x260   : > { %1205 = vsyncadd (%p1118_p1), %s913_s25, 4294967168  ;;  %p18_p2 = scmp.ge.s32.totalorder %s1296_s11, 4   ;;  %s1612_s27 = smov %s1212_s28 }
 0x261   : > { %s1613_s28 = smov %s1216_s29  ;;  %s1614_s29 = smov %s1307_s14 }
 0x262   : > { %s1615_s30 = smov %s1296_s11  ;;  %20 = sbr.rel (!%p18_p2) target bundleno = 3 (0x3), region = 93 }
 0x267   :  { %918 = vsyncpa [#allocation3], 1 }
 0x268   :  { %920 = vsyncpa [#allocation3 + $0x1], 1 }

</bundles_post_ra>
